<compile_context>
chip_gen: v6e
topology: v6e:2x2x1
jax: 0.10.0
libtpu: 0.0.40
codegen_flags: <defaults>
</compile_context>

<pallas_src>
import jax
import jax.numpy as jnp
from jax.experimental import pallas as pl
from jax.experimental.pallas import tpu as pltpu


GENRES = ["bc", "bn", "mz", "nw", "pt", "tc", "wb"]
_STOI = {g: i + 1 for i, g in enumerate(GENRES)}  # 0 is the "unknown" pad id
GENRE_DIM = 20
VOCAB = len(GENRES) + 1  # 8 rows, row 0 is the zero padding row

_TN_MAX = 16384          # max lanes per tile (~1.3 MiB f32 output tile)
_MIN_GRID_STEPS = 4      # keep >= 4 grid steps so v7x's 2 TCs both get work
_SMALL_N_FASTPATH = 4096 # below this, a plain XLA gather beats kernel launch cost


def _round_up(x: int, m: int) -> int:
    return (x + m - 1) // m * m


def _embed_kernel(ids_ref, table_t_ref, out_t_ref):
    """One tile: out_t[d, n] = table_t[d, ids[n]] via a 3-level bit-select tree.

    ids_ref:     (1, TN)  int32   (labels on lanes, already clamped to [0, VOCAB))
    table_t_ref: (D, V)   float32 (transposed table, constant/resident block)
    out_t_ref:   (D, TN)  f32/bf16 (embedding, transposed -> lane-dense stores)
    """
    ids = ids_ref[...]                                   # (1, TN) int32
    table_t = table_t_ref[...]                           # (D, V)  f32

    # Hoist the 8 column slices (D, 1) once per tile (no full (D,TN) pre-broadcast).
    c = [table_t[:, v : v + 1] for v in range(VOCAB)]

    # Bit masks of the id (lane-dense (1, TN) booleans), computed once per tile.
    b0 = (ids & 1) != 0
    b1 = (ids & 2) != 0
    b2 = (ids & 4) != 0

    # 3-level binary select tree: 7 full-width selects per output tile
    # (vs 8 selects + 8 adds for the naive one-hot accumulate).
    s01 = jnp.where(b0, c[1], c[0])
    s23 = jnp.where(b0, c[3], c[2])
    s45 = jnp.where(b0, c[5], c[4])
    s67 = jnp.where(b0, c[7], c[6])
    s0123 = jnp.where(b1, s23, s01)
    s4567 = jnp.where(b1, s67, s45)
    out = jnp.where(b2, s4567, s0123)                    # (D, TN) f32

    out_t_ref[...] = out.astype(out_t_ref.dtype)


def genre_embed(
    label_ids: jnp.ndarray,
    table: jnp.ndarray,
    *,
    tile_n: int | None = None,
    out_layout: str = "nd",          # "nd" -> (N, D) like torch; "dn" -> (D, N), no transpose
    out_dtype=jnp.float32,           # bf16 supported (halves writeback bytes)
    small_n_threshold: int = _SMALL_N_FASTPATH,
) -> jnp.ndarray:
    """label_ids: (N,) int32; table: (VOCAB, GENRE_DIM) f32 with row 0 all zeros.

    Out-of-range / negative ids are mapped to id 0 (the zero padding row), matching
    the module's 'zeros if genre unknown' semantics (torch would error on OOB).
    """
    assert out_layout in ("nd", "dn")
    n = int(label_ids.shape[0])

    # Empty-input guard.
    if n == 0:
        shape = (0, GENRE_DIM) if out_layout == "nd" else (GENRE_DIM, 0)
        return jnp.zeros(shape, out_dtype)

    ids = label_ids.astype(jnp.int32)
    ids = jnp.where((ids >= 0) & (ids < VOCAB), ids, 0)   # clamp unknowns to pad row

    # Small-N fast path: kernel launch + padding + layout plumbing would dominate.
    if n < small_n_threshold:
        out = table.astype(out_dtype)[ids]                # (N, D) XLA gather
        return out if out_layout == "nd" else out.T

    # ---- tile selection ---------------------------------------------------
    n_pad128 = _round_up(n, 128)
    if tile_n is None:
        # Big tiles to amortize per-step overhead, but keep >= _MIN_GRID_STEPS
        # grid steps so the 'parallel' axis shards across v7x's two TensorCores.
        tile_n = min(_TN_MAX, _round_up(pl.cdiv(n_pad128, _MIN_GRID_STEPS), 128))
    tile_n = max(128, _round_up(int(tile_n), 128))
    tile_n = min(tile_n, n_pad128)
    n_pad = _round_up(n, tile_n)
    grid = (pl.cdiv(n_pad, tile_n),)

    # ids as a lane-dense (1, N_pad) row; padded positions use id 0 (zero row).
    ids_row = jnp.zeros((n_pad,), jnp.int32).at[:n].set(ids).reshape(1, n_pad)
    table_t = table.astype(jnp.float32).T                 # (D, V) = (20, 8)

    out_bytes = jnp.dtype(out_dtype).itemsize
    cost = pl.CostEstimate(
        flops=7 * n_pad * GENRE_DIM,
        transcendentals=0,
        bytes_accessed=4 * n_pad + 4 * VOCAB * GENRE_DIM + out_bytes * n_pad * GENRE_DIM,
    )

    out_t = pl.pallas_call(
        _embed_kernel,
        out_shape=jax.ShapeDtypeStruct((GENRE_DIM, n_pad), out_dtype),
        grid_spec=pltpu.PrefetchScalarGridSpec(
            num_scalar_prefetch=0,
            grid=grid,
            in_specs=[
                # ids: stream one (1, TILE_N) lane-dense row per grid step.
                pl.BlockSpec((1, tile_n), lambda i: (0, i)),
                # table^T: tiny constant-index block, stays resident across steps.
                pl.BlockSpec((GENRE_DIM, VOCAB), lambda i: (0, 0)),
            ],
            out_specs=pl.BlockSpec((GENRE_DIM, tile_n), lambda i: (0, i)),
        ),
        compiler_params=pltpu.CompilerParams(
            dimension_semantics=("parallel",),
        ),
        cost_estimate=cost,
    )(ids_row, table_t)

    if out_layout == "dn":
        return out_t[:, :n]           # (D, N): no transpose pass over HBM
    return out_t.T[:n]                # (N, D): reference torch layout (extra pass)


def stoi(labels):
    """Map genre strings -> embedding ids (0 if unknown). Pure Python glue."""
    return jnp.asarray([_STOI.get(g, 0) for g in labels], dtype=jnp.int32)


def make_params(key):
    """Init matching nn.Embedding(VOCAB, GENRE_DIM, padding_idx=0):
    normal(0,1) with the padding row zeroed."""
    table = jax.random.normal(key, (VOCAB, GENRE_DIM), dtype=jnp.float32)
    table = table.at[0].set(0.0)
    return table


if __name__ == "__main__":
    key = jax.random.PRNGKey(0)
    table = make_params(key)

    # --- Small example batch of genre labels (seq = 8), incl. unknowns --------
    labels = ["bc", "nw", "??", "tc", "wb", "mz", "unknown", "pt"]
    ids = stoi(labels)

    out = jax.block_until_ready(genre_embed(ids, table))          # fast path
    ref = table[ids]
    assert out.shape == (len(labels), GENRE_DIM)
    assert jnp.allclose(out, ref, atol=1e-5), "small-N mismatch vs reference"
    assert jnp.all(out[2] == 0.0) and jnp.all(out[6] == 0.0)      # padding_idx=0

    # --- Force the Pallas kernel path, multiple grid steps (N=300, tile=128) --
    key_ids = jax.random.PRNGKey(1)
    big_ids = jax.random.randint(key_ids, (300,), 0, VOCAB, dtype=jnp.int32)
    k_out = jax.block_until_ready(
        genre_embed(big_ids, table, tile_n=128, small_n_threshold=0)
    )
    assert k_out.shape == (300, GENRE_DIM)
    assert jnp.allclose(k_out, table[big_ids], atol=1e-5), "tiled kernel mismatch"

    # Kernel path, (D, N) layout (no wrapper transpose) + auto tile selection.
    k_out_dn = jax.block_until_ready(
        genre_embed(big_ids, table, out_layout="dn", small_n_threshold=0)
    )
    assert k_out_dn.shape == (GENRE_DIM, 300)
    assert jnp.allclose(k_out_dn, table[big_ids].T, atol=1e-5), "dn layout mismatch"

    # --- Larger case: default auto tiling (>= fast-path threshold) + bf16 out -
    n_big = 9000
    big_ids2 = jax.random.randint(jax.random.PRNGKey(2), (n_big,), 0, VOCAB, jnp.int32)
    big_out = jax.block_until_ready(genre_embed(big_ids2, table))
    assert big_out.shape == (n_big, GENRE_DIM)
    assert jnp.allclose(big_out, table[big_ids2], atol=1e-5), "auto-tile mismatch"

    bf16_out = jax.block_until_ready(
        genre_embed(big_ids2, table, out_layout="dn", out_dtype=jnp.bfloat16)
    )
    assert bf16_out.dtype == jnp.bfloat16
    assert jnp.allclose(
        bf16_out.astype(jnp.float32), table[big_ids2].T, atol=2e-2
    ), "bf16 path mismatch"

    # Empty-input guard.
    empty = genre_embed(jnp.zeros((0,), jnp.int32), table)
    assert empty.shape == (0, GENRE_DIM)

    print("KERNEL_OK")
</pallas_src>

<mosaic_0001>
module attributes {stable_mosaic.version = 11 : i64} {
  func.func @_embed_kernel(%arg0: i32, %arg1: memref<1x128xi32, #tpu.memory_space<vmem>>, %arg2: memref<20x8xf32, #tpu.memory_space<vmem>>, %arg3: memref<20x128xf32, #tpu.memory_space<vmem>>) attributes {dimension_semantics = [#tpu.dimension_semantics<parallel>], iteration_bounds = array<i64: 3>, scalar_prefetch = 0 : i64, scratch_operands = 0 : i64, tpu.core_type = #tpu.core_type<tc>, window_params = [{transform_indices = @transform_0, window_bounds = array<i64: 1, 128>}, {pipeline_mode = #tpu.pipeline_mode<synchronous>, transform_indices = @transform_1, window_bounds = array<i64: 20, 8>}, {transform_indices = @transform_2, window_bounds = array<i64: 20, 128>}]} {
    %c0 = arith.constant 0 : index
    %c0_0 = arith.constant 0 : index
    %0 = vector.load %arg1[%c0, %c0_0] : memref<1x128xi32, #tpu.memory_space<vmem>>, vector<1x128xi32>
    %c0_1 = arith.constant 0 : index
    %c0_2 = arith.constant 0 : index
    %1 = vector.load %arg2[%c0_1, %c0_2] : memref<20x8xf32, #tpu.memory_space<vmem>>, vector<20x8xf32>
    %2 = vector.extract_strided_slice %1 {offsets = [0, 0], sizes = [20, 1], strides = [1, 1]} : vector<20x8xf32> to vector<20x1xf32>
    %3 = vector.extract_strided_slice %1 {offsets = [0, 1], sizes = [20, 1], strides = [1, 1]} : vector<20x8xf32> to vector<20x1xf32>
    %4 = vector.extract_strided_slice %1 {offsets = [0, 2], sizes = [20, 1], strides = [1, 1]} : vector<20x8xf32> to vector<20x1xf32>
    %5 = vector.extract_strided_slice %1 {offsets = [0, 3], sizes = [20, 1], strides = [1, 1]} : vector<20x8xf32> to vector<20x1xf32>
    %6 = vector.extract_strided_slice %1 {offsets = [0, 4], sizes = [20, 1], strides = [1, 1]} : vector<20x8xf32> to vector<20x1xf32>
    %7 = vector.extract_strided_slice %1 {offsets = [0, 5], sizes = [20, 1], strides = [1, 1]} : vector<20x8xf32> to vector<20x1xf32>
    %8 = vector.extract_strided_slice %1 {offsets = [0, 6], sizes = [20, 1], strides = [1, 1]} : vector<20x8xf32> to vector<20x1xf32>
    %9 = vector.extract_strided_slice %1 {offsets = [0, 7], sizes = [20, 1], strides = [1, 1]} : vector<20x8xf32> to vector<20x1xf32>
    %c1_i32 = arith.constant 1 : i32
    %10 = vector.broadcast %c1_i32 : i32 to vector<1x128xi32>
    %11 = arith.andi %0, %10 : vector<1x128xi32>
    %c0_i32 = arith.constant 0 : i32
    %12 = vector.broadcast %c0_i32 : i32 to vector<1x128xi32>
    %13 = arith.cmpi ne, %11, %12 : vector<1x128xi32>
    %c2_i32 = arith.constant 2 : i32
    %14 = vector.broadcast %c2_i32 : i32 to vector<1x128xi32>
    %15 = arith.andi %0, %14 : vector<1x128xi32>
    %c0_i32_3 = arith.constant 0 : i32
    %16 = vector.broadcast %c0_i32_3 : i32 to vector<1x128xi32>
    %17 = arith.cmpi ne, %15, %16 : vector<1x128xi32>
    %c4_i32 = arith.constant 4 : i32
    %18 = vector.broadcast %c4_i32 : i32 to vector<1x128xi32>
    %19 = arith.andi %0, %18 : vector<1x128xi32>
    %c0_i32_4 = arith.constant 0 : i32
    %20 = vector.broadcast %c0_i32_4 : i32 to vector<1x128xi32>
    %21 = arith.cmpi ne, %19, %20 : vector<1x128xi32>
    %22 = vector.shape_cast %13 : vector<1x128xi1> to vector<1x128xi1>
    %23 = vector.broadcast %22 : vector<1x128xi1> to vector<20x128xi1>
    %24 = vector.shape_cast %3 : vector<20x1xf32> to vector<20x1xf32>
    %25 = vector.broadcast %24 : vector<20x1xf32> to vector<20x128xf32>
    %26 = vector.shape_cast %2 : vector<20x1xf32> to vector<20x1xf32>
    %27 = vector.broadcast %26 : vector<20x1xf32> to vector<20x128xf32>
    %28 = arith.select %23, %25, %27 : vector<20x128xi1>, vector<20x128xf32>
    %29 = vector.shape_cast %13 : vector<1x128xi1> to vector<1x128xi1>
    %30 = vector.broadcast %29 : vector<1x128xi1> to vector<20x128xi1>
    %31 = vector.shape_cast %5 : vector<20x1xf32> to vector<20x1xf32>
    %32 = vector.broadcast %31 : vector<20x1xf32> to vector<20x128xf32>
    %33 = vector.shape_cast %4 : vector<20x1xf32> to vector<20x1xf32>
    %34 = vector.broadcast %33 : vector<20x1xf32> to vector<20x128xf32>
    %35 = arith.select %30, %32, %34 : vector<20x128xi1>, vector<20x128xf32>
    %36 = vector.shape_cast %13 : vector<1x128xi1> to vector<1x128xi1>
    %37 = vector.broadcast %36 : vector<1x128xi1> to vector<20x128xi1>
    %38 = vector.shape_cast %7 : vector<20x1xf32> to vector<20x1xf32>
    %39 = vector.broadcast %38 : vector<20x1xf32> to vector<20x128xf32>
    %40 = vector.shape_cast %6 : vector<20x1xf32> to vector<20x1xf32>
    %41 = vector.broadcast %40 : vector<20x1xf32> to vector<20x128xf32>
    %42 = arith.select %37, %39, %41 : vector<20x128xi1>, vector<20x128xf32>
    %43 = vector.shape_cast %13 : vector<1x128xi1> to vector<1x128xi1>
    %44 = vector.broadcast %43 : vector<1x128xi1> to vector<20x128xi1>
    %45 = vector.shape_cast %9 : vector<20x1xf32> to vector<20x1xf32>
    %46 = vector.broadcast %45 : vector<20x1xf32> to vector<20x128xf32>
    %47 = vector.shape_cast %8 : vector<20x1xf32> to vector<20x1xf32>
    %48 = vector.broadcast %47 : vector<20x1xf32> to vector<20x128xf32>
    %49 = arith.select %44, %46, %48 : vector<20x128xi1>, vector<20x128xf32>
    %50 = vector.shape_cast %17 : vector<1x128xi1> to vector<1x128xi1>
    %51 = vector.broadcast %50 : vector<1x128xi1> to vector<20x128xi1>
    %52 = arith.select %51, %35, %28 : vector<20x128xi1>, vector<20x128xf32>
    %53 = vector.shape_cast %17 : vector<1x128xi1> to vector<1x128xi1>
    %54 = vector.broadcast %53 : vector<1x128xi1> to vector<20x128xi1>
    %55 = arith.select %54, %49, %42 : vector<20x128xi1>, vector<20x128xf32>
    %56 = vector.shape_cast %21 : vector<1x128xi1> to vector<1x128xi1>
    %57 = vector.broadcast %56 : vector<1x128xi1> to vector<20x128xi1>
    %58 = arith.select %57, %55, %52 : vector<20x128xi1>, vector<20x128xf32>
    %c0_5 = arith.constant 0 : index
    %c0_6 = arith.constant 0 : index
    %59 = vector.load %arg3[%c0_5, %c0_6] : memref<20x128xf32, #tpu.memory_space<vmem>>, vector<20x128xf32>
    tpu.vector_store %arg3[%c0_5, %c0_6], %58 {strides = array<i32>} : memref<20x128xf32, #tpu.memory_space<vmem>>, vector<20x128xf32>,
    return
  }
  func.func @transform_0(%arg0: i32) -> (i32, i32) {
    %c0_i32 = arith.constant 0 : i32
    %c0_i32_0 = arith.constant 0 : i32
    return %c0_i32, %arg0 : i32, i32
  }
  func.func @transform_1(%arg0: i32) -> (i32, i32) {
    %c0_i32 = arith.constant 0 : i32
    %c0_i32_0 = arith.constant 0 : i32
    %c0_i32_1 = arith.constant 0 : i32
    return %c0_i32, %c0_i32_0 : i32, i32
  }
  func.func @transform_2(%arg0: i32) -> (i32, i32) {
    %c0_i32 = arith.constant 0 : i32
    %c0_i32_0 = arith.constant 0 : i32
    return %c0_i32, %arg0 : i32, i32
  }
}

</mosaic_0001>

<bundles_post_ra>
// kernel: tpu_custom_call.1
= control target key start
LH: loop header
LB: loop body
LE: loop exit
PB: predicated region body
PF: predicated region fallthrough
CT: control target
= control target key end

     0   :  { %7 = vsyncpa [#allocation3], 0  ;;  %s705_s0 = inlined_call_operand.vmem [shape: s32[1,384], index: 0, kind: input, shape index: {}]   ;;  %s706_s1 = inlined_call_operand.vmem [shape: f32[20,8], index: 1, kind: input, shape index: {}]   ;;  %s707_s2 = inlined_call_operand.hbm [shape: f32[20,384], index: 2, kind: output, shape index: {}]  }
   0x1   :  { %9 = vsyncpa [#allocation3 + $0x1], 0  ;;  %s522_s9 = smov 0   ;;  %s524_s10 = smov 0  }
   0x2   :  { %s526_s11 = smov 0   ;;  %s528_s12 = smov 0  }
   0x3 LB: > { %s543_s13 = sadd.s32 4294967295, %s493_s12   ;;  %s359_s14 = sadd.s32 4294967294, %s493_s12   ;;  %s493_s12 = sphi %s528_s12, %s719_s12   ;;  %s489_s11 = sphi %s526_s11, %s718_s11   ;;  %s485_s10 = sphi %s524_s10, %s717_s10   ;;  %s481_s9 = sphi %s522_s9, %s716_s9  }
   0x4   : > { %s547_s15 = sadd.s32 1, %s493_s12   ;;  %s69_s16 = sadd.s32 1, %s489_s11 }
   0x5   : > { %s66_s17 = ssub.s32 %s493_s12, %s547_s15  ;;  %p79_p0 = scmp.ne.s32.totalorder %s489_s11, %s485_s10 }
   0x6   : > { %p67_p1 = scmp.eq.s32.totalorder %s66_s17, 0  ;;  %p80_p2 = scmp.eq.s32.totalorder %s543_s13, 2 }
   0x7   : > { %p85_p3 = scmp.ne.s32.totalorder %s485_s10, %s481_s9  ;;  %p86_p4 = scmp.eq.s32.totalorder %s359_s14, 2 }
   0x8   : > { %s558_s18 = scalar_select %p67_p1, %s489_s11, %s69_s16  }
   0x9   : > { %p560_p5 = por %p80_p2, %p79_p0  ;;  %p564_p6 = por %p86_p4, %p85_p3 }
   0xa   : > { %p362_p7 = scmp.ge.s32.totalorder %s493_s12, 1  ;;  %p113_p8 = scmp.lt.s32.totalorder %s493_s12, 4 }
   0xc   : > { %p114_p9 = pnand %p362_p7, %p113_p8 }
   0xd   : > { %p133_p10 = scmp.lt.s32.totalorder (!%p114_p9), %s543_s13, 2  ;;  %s130_s3 = sand.u32 (!%p114_p9), 1, %s485_s10  }
   0xe   : > { %117 = sbr.rel (%p114_p9) target bundleno = 226 (0xe2), region = 28  ;;  %s363_s7 = sshll.u32 (!%p114_p9), %s543_s13, 7 }
   0xf   : > { %s366_s4 = smul.u32 (!%p114_p9), 24, %s130_s3  ;;  %s655_s14 = scalar_lea.hbm (!%p114_p9), %s707_s2, %s363_s7 }
  0x10   : > { %s665_s16 = scalar_lea.sflag (!%p114_p9), [#allocation3], %s130_s3  ;;  %s503_s21 = smov (!%p114_p9), [#allocation2]  }
  0x11   : > { %s132_s5 = scalar_lea.vmem (!%p114_p9), [#allocation2], %s366_s4  ;;  %s437_s22 = sshll.u32 (!%p114_p9), %s503_s21, 4  ;;  %s438_s22 = int_to_ptr.vmem [resolvable:$false] %s437_s22 }
  0x12   : > { %s300_s6 = sshll.u32 (!%p114_p9), %s132_s5, 4  ;;  %s439_s23 = scalar_lea.vmem (!%p114_p9), %s438_s22, 768  ;;  %s642_s6 = int_to_ptr.vmem [resolvable:$true] %s300_s6 }
  0x13   : > { %v139_v0 = vld [vmem:[%s706_s1 + $0x10] sm:$0xf]  ;;  %v137_v1 = vld [vmem:[%s706_s1] sm:$0xff]  ;;  %v495_v2 = vmov 1   ;;  %v138_v3 = vld [vmem:[%s706_s1 + $0x8] sm:$0xff]  ;;  %v496_v4 = vmov 0   ;;  %v147_v22 = vlaneseq  ;;  %p440_p0 = scmp.lt.s32.totalorder %s642_s6, %s438_s22 }
  0x14   : > { %418 = vset.pattern.permute.xlu1 %v495_v2  ;;  %417 = vset.pattern.permute.xlu0 %v495_v2  ;;  %v497_v5 = vmov 3   ;;  %v498_v6 = vmov 2   ;;  %v499_v7 = vmov 5   ;;  %v500_v8 = vmov 4   ;;  %s134_s27 = scalar_select %p133_p10, %s543_s13, 2 }
  0x15   : > { %164 = vperm.xlu1 %418, %v139_v0   ;;  %154 = vperm.xlu0 %417, %v137_v1   ;;  %v501_v9 = vmov 7   ;;  %v502_v10 = vmov 6   ;;  %v148_v27 = vshrl.u32 %v147_v22, 7  ;;  %s433_s17 = scalar_lea.vmem %s642_s6, 384 }
  0x16   : > { %s135_s30 = scalar_lea.vmem %s705_s0, %s134_s27  ;;  %p434_p11 = scmp.ne.s32.totalorder %s642_s6, %s433_s17 }
  0x17   : > { %v136_v21 = vld [vmem:[%s135_s30] sm:$0x1]  ;;  %v149_v30 = vsub.s32 0, %v148_v27  ;;  %p441_p1 = scmp.lt.s32.totalorder %s439_s23, %s433_s17 }
  0x18   : > { %v140_v23 = vand.u32 1, %v136_v21  ;;  %v142_v25 = vand.u32 2, %v136_v21  ;;  %v144_v28 = vand.u32 4, %v136_v21  ;;  %p435_p12 = pnand %p434_p11, %p560_p5 }
  0x19   : > { %419 = vset.pattern.permute.xlu1 %v496_v4  ;;  %159 = vperm.xlu0 %417, %v138_v3   ;;  %p442_p2 = por %p441_p1, %p440_p0 }
  0x1a   : > { %168 = vperm.xlu1 %419, %v137_v1   ;;  %vm141_vm0 = vcmp.ne.s32.totalorder %v140_v23, 0  ;;  %vm143_vm1 = vcmp.ne.s32.totalorder %v142_v25, 0  ;;  %vm145_vm2 = vcmp.ne.s32.totalorder %v144_v28, 0  ;;  %p436_p13 = pneg %p435_p12 }
  0x1b   : > { %v146_v32 = vsel %vm141_vm0, 1, %v496_v4  ;;  %v263_v33 = vsel %vm143_vm1, 1, %v496_v4  ;;  %v275_v35 = vsel %vm145_vm2, 1, %v496_v4 }
  0x1c   : > { %v150_v36 = vrot.slane %v146_v32, %v149_v30  ;;  %v267_v37 = vrot.slane %v263_v33, %v149_v30  ;;  %v279_v39 = vrot.slane %v275_v35, %v149_v30  ;;  %p443_p3 = pnand %p442_p2, %p436_p13 }
  0x1d   : > { %420 = vset.pattern.permute.xlu0 %v496_v4 }
  0x1e   : > { %176 = vperm.xlu1 %419, %v139_v0   ;;  %172 = vperm.xlu0 %420, %v138_v3   ;;  %vm598_vm3 = vcmp.eq.s32.totalorder %v150_v36, 1  ;;  %vm604_vm4 = vcmp.eq.s32.totalorder %v267_v37, 1  ;;  %vm612_vm5 = vcmp.eq.s32.totalorder %v279_v39, 1 }
  0x22   : > { %421 = vset.pattern.permute.xlu1 %v497_v5  ;;  %422 = vset.pattern.permute.xlu0 %v497_v5 }
  0x23   : > { %183 = vperm.xlu1 %421, %v137_v1   ;;  %187 = vperm.xlu0 %422, %v138_v3  }
  0x27   : > { %191 = vperm.xlu1 %421, %v139_v0   ;;  %424 = vset.pattern.permute.xlu0 %v498_v6 }
  0x28   : > { %199 = vperm.xlu0 %424, %v138_v3  }
  0x2b   : > { %423 = vset.pattern.permute.xlu1 %v498_v6 }
  0x2c   : > { %195 = vperm.xlu1 %423, %v137_v1   ;;  %426 = vset.pattern.permute.xlu0 %v499_v7 }
  0x2d   : > { %214 = vperm.xlu0 %426, %v138_v3  }
  0x30   : > { %203 = vperm.xlu1 %423, %v139_v0  }
  0x31   : > { %428 = vset.pattern.permute.xlu0 %v500_v8 }
  0x32   : > { %226 = vperm.xlu0 %428, %v138_v3  }
  0x34   : > { %425 = vset.pattern.permute.xlu1 %v499_v7 }
  0x35   : > { %210 = vperm.xlu1 %425, %v137_v1  }
  0x36   : > { %430 = vset.pattern.permute.xlu0 %v501_v9 }
  0x37   : > { %241 = vperm.xlu0 %430, %v138_v3  }
  0x39   : > { %218 = vperm.xlu1 %425, %v139_v0  }
  0x3b   : > { %432 = vset.pattern.permute.xlu0 %v502_v10 }
  0x3c   : > { %253 = vperm.xlu0 %432, %v138_v3  }
  0x3d   : > { %427 = vset.pattern.permute.xlu1 %v500_v8 }
  0x3e   : > { %222 = vperm.xlu1 %427, %v137_v1  }
  0x42   : > { %230 = vperm.xlu1 %427, %v139_v0  }
  0x46   : > { %429 = vset.pattern.permute.xlu1 %v501_v9 }
  0x47   : > { %237 = vperm.xlu1 %429, %v137_v1  }
  0x4b   : > { %245 = vperm.xlu1 %429, %v139_v0  }
  0x4f   : > { %431 = vset.pattern.permute.xlu1 %v502_v10 }
  0x50   : > { %249 = vperm.xlu1 %431, %v137_v1  }
  0x54   : > { %257 = vperm.xlu1 %431, %v139_v0  }
  0x90   : > { %v581_v11 = vpop.permute.xlu1 %164  ;;  %v155_v12 = vpop.permute.xlu0 %154 }
  0x94   : > { %v160_v13 = vpop.permute.xlu0 %159 }
  0x95   : > { %v169_v14 = vpop.permute.xlu1 %168 }
  0x96   : > { %v179_v58 = vsel %vm598_vm3, %v155_v12, %v169_v14 }
  0x99   : > { %v584_v15 = vpop.permute.xlu1 %176  ;;  %v173_v16 = vpop.permute.xlu0 %172 }
  0x9a   : > { %v180_v42 = vsel %vm598_vm3, %v160_v13, %v173_v16  ;;  %v181_v2 = vsel %vm598_vm3, %v581_v11, %v584_v15 }
  0x9e   : > { %v184_v17 = vpop.permute.xlu1 %183  ;;  %v188_v18 = vpop.permute.xlu0 %187 }
  0xa2   : > { %v590_v19 = vpop.permute.xlu1 %191 }
  0xa3   : > { %v200_v20 = vpop.permute.xlu0 %199 }
  0xa4   : > { %v207_v44 = vsel %vm598_vm3, %v188_v18, %v200_v20 }
  0xa5   : > { %v270_v49 = vsel %vm604_vm4, %v207_v44, %v180_v42 }
  0xa7   : > { %v196_v24 = vpop.permute.xlu1 %195 }
  0xa8   : > { %v215_v26 = vpop.permute.xlu0 %214  ;;  %v206_v56 = vsel %vm598_vm3, %v184_v17, %v196_v24 }
  0xa9   : > { %v269_v61 = vsel %vm604_vm4, %v206_v56, %v179_v58 }
  0xab   : > { %v204_v29 = vpop.permute.xlu1 %203 }
  0xac   : > { %v208_v63 = vsel %vm598_vm3, %v590_v19, %v204_v29 }
  0xad   : > { %v227_v31 = vpop.permute.xlu0 %226  ;;  %v271_v5 = vsel %vm604_vm4, %v208_v63, %v181_v2 }
  0xae   : > { %v234_v45 = vsel %vm598_vm3, %v215_v26, %v227_v31 }
  0xb0   : > { %v211_v34 = vpop.permute.xlu1 %210 }
  0xb2   : > { %v242_v38 = vpop.permute.xlu0 %241 }
  0xb4   : > { %v219_v40 = vpop.permute.xlu1 %218 }
  0xb7   : > { %v254_v46 = vpop.permute.xlu0 %253 }
  0xb8   : > { %v261_v48 = vsel %vm598_vm3, %v242_v38, %v254_v46 }
  0xb9   : > { %v273_v50 = vsel %vm604_vm4, %v261_v48, %v234_v45  ;;  %v223_v51 = vpop.permute.xlu1 %222 }
  0xba   : > { %v282_v52 = vsel %vm612_vm5, %v273_v50, %v270_v49  ;;  %v233_v59 = vsel %vm598_vm3, %v211_v34, %v223_v51 }
  0xbb   : > { %285 = vst [vmem:[%s132_s5 + $0x8] sm:$0xff] %v282_v52 }
  0xbd   : > { %v231_v53 = vpop.permute.xlu1 %230 }
  0xbe   : > { %v235_v3 = vsel %vm598_vm3, %v219_v40, %v231_v53 }
  0xc2   : > { %v238_v54 = vpop.permute.xlu1 %237 }
  0xc6   : > { %v246_v55 = vpop.permute.xlu1 %245 }
  0xcb   : > { %v250_v57 = vpop.permute.xlu1 %249 }
  0xcc   : > { %v260_v60 = vsel %vm598_vm3, %v238_v54, %v250_v57 }
  0xcd   : > { %v272_v62 = vsel %vm604_vm4, %v260_v60, %v233_v59 }
  0xce   : > { %v281_v0 = vsel %vm612_vm5, %v272_v62, %v269_v61 }
  0xcf   : > { %284 = vst [vmem:[%s132_s5] sm:$0xff] %v281_v0  ;;  %v258_v1 = vpop.permute.xlu1 %257 }
  0xd0   : > { %v262_v4 = vsel %vm598_vm3, %v246_v55, %v258_v1 }
  0xd1   : > { %v274_v6 = vsel %vm604_vm4, %v262_v4, %v235_v3 }
  0xd2   : > { %v283_v7 = vsel %vm612_vm5, %v274_v6, %v271_v5 }
  0xd3   : > { %286 = vst [vmem:[%s132_s5 + $0x10] sm:$0xf] %v283_v7 }
  0xd4   : > { %446 = shalt.err (!%p443_p3)
}
  0xd5   : > { %s447_s24 = scalar_lea.hbm %s655_s14, 384  ;;  %s451_s27 = scalar_lea.hbm %s707_s2, 1152 }
  0xd6   : > { %p448_p4 = scmp.ne.s32.totalorder %s655_s14, %s447_s24  ;;  %p452_p9 = scmp.lt.s32.totalorder %s655_s14, %s707_s2 }
  0xd7   : > { %p453_p10 = scmp.lt.s32.totalorder %s451_s27, %s447_s24 }
  0xd8   : > { %p449_p7 = pnand %p448_p4, %p560_p5 }
  0xd9   : > { %p454_p11 = por %p453_p10, %p452_p9 }
  0xda   : > { %p450_p8 = pneg %p449_p7 }
  0xdc   : > { %p455_p12 = pnand %p454_p11, %p450_p8 }
  0xde   : > { %458 = shalt.err (!%p455_p12)
}
  0xdf   : > { %s504_s30 = smov 128   ;;  %s505_s3 = smov 384  }
  0xe0   : > { %s506_s4 = smov 8  }
  0xe1   : > { %367 = dma.vmem_to_hbm [thread:$0]  (%p560_p5), %s642_s6, 384, %s655_s14, %s665_s16, %s504_s30, %s505_s3, %s506_s4  }
  0xe2 PF: > { %p373_p13 = scmp.ge.s32.totalorder %s493_s12, 2  ;;  %s315_s5 = sand.u32 1, %s481_s9  }
  0xe3   : > { %s316_s7 = scalar_lea.sflag [#allocation3], %s315_s5 }
  0xe4   : > { %p370_p0 = pnand %p373_p13, %p564_p6 }
  0xe6   : > { %p371_p1 = pneg %p370_p0 }
  0xe8   : > { %476 = dma.done.wait (%p371_p1), %s316_s7, 384  }
  0xe9   : > { %478 = vsyncadd (%p371_p1), %s316_s7, 4294966912  ;;  %p12_p2 = scmp.ge.s32.totalorder %s547_s15, 5   ;;  %s716_s9 = smov %s485_s10 }
  0xea   : > { %s717_s10 = smov %s489_s11  ;;  %s718_s11 = smov %s558_s18 }
  0xeb   : > { %s719_s12 = smov %s547_s15  ;;  %14 = sbr.rel (!%p12_p2) target bundleno = 3 (0x3), region = 63 }
  0xf0   :  { %321 = vsyncpa [#allocation3], 1 }
  0xf1   :  { %323 = vsyncpa [#allocation3 + $0x1], 1 }

</bundles_post_ra>
